<compile_context>
chip_gen: v5e
topology: v5e:2x2
jax: 0.10.0
libtpu: 0.0.40
codegen_flags: <defaults>
</compile_context>

<pallas_src>
import functools

import jax
import jax.numpy as jnp
from jax.experimental import pallas as pl
from jax.experimental.pallas import tpu as pltpu

# Logical PyTorch layer sizes.
DIMS = [(7, 128), (128, 64), (64, 32), (32, 2)]
# Padded kernel-internal sizes (sublane/lane friendly).
K_PAD = 8        # input features 7 -> 8
H_PAD = 128      # hidden widths 64/32 -> 128
OUT_PAD = 128    # output 2 -> 128 (lane-dense stores)
DEFAULT_TILE_B = 2048  # ~2.2 MiB of VMEM double-buffered; fits v5e/v6e/v7x scoped VMEM


def _round_up(x, m):
    return (x + m - 1) // m * m


def mlp_kernel(x_ref, w1_ref, b1_ref, w2_ref, b2_ref, w3_ref, b3_ref,
               w4_ref, b4_ref, o_ref):
    """One (TILE_B, K_PAD) batch tile through the whole 4-layer MLP.

    All matmuls are bf16 x bf16 -> f32 on the MXU; bias-add/ReLU in f32.
    Weights/biases are VMEM-resident across grid steps (constant index_maps).
    """
    x = x_ref[...]                                                  # bf16 (T, 8)

    h = jnp.dot(x, w1_ref[...], preferred_element_type=jnp.float32) + b1_ref[...]
    h = jnp.maximum(h, 0.0).astype(jnp.bfloat16)                    # (T, 128)

    h = jnp.dot(h, w2_ref[...], preferred_element_type=jnp.float32) + b2_ref[...]
    h = jnp.maximum(h, 0.0).astype(jnp.bfloat16)                    # (T, 128)

    h = jnp.dot(h, w3_ref[...], preferred_element_type=jnp.float32) + b3_ref[...]
    h = jnp.maximum(h, 0.0).astype(jnp.bfloat16)                    # (T, 128)

    out = jnp.dot(h, w4_ref[...], preferred_element_type=jnp.float32) + b4_ref[...]
    o_ref[...] = out.astype(o_ref.dtype)                            # (T, 128), cols >=2 are 0


def _pad_params(params):
    """Zero-pad weights/biases to padded shapes; cast weights to bf16, keep biases f32.

    Zero padding is semantics-preserving: padded hidden columns come out as
    ReLU(0) = 0 and multiply zero weight rows in the next layer; padded output
    columns are exactly 0 and get sliced off in the wrapper.
    """
    def pad2(a, r, c):
        return jnp.pad(a, ((0, r - a.shape[0]), (0, c - a.shape[1])))

    w1 = pad2(params["w1"], K_PAD, H_PAD).astype(jnp.bfloat16)
    w2 = pad2(params["w2"], H_PAD, H_PAD).astype(jnp.bfloat16)
    w3 = pad2(params["w3"], H_PAD, H_PAD).astype(jnp.bfloat16)
    w4 = pad2(params["w4"], H_PAD, OUT_PAD).astype(jnp.bfloat16)
    b1 = pad2(params["b1"], 1, H_PAD).astype(jnp.float32)
    b2 = pad2(params["b2"], 1, H_PAD).astype(jnp.float32)
    b3 = pad2(params["b3"], 1, H_PAD).astype(jnp.float32)
    b4 = pad2(params["b4"], 1, OUT_PAD).astype(jnp.float32)
    return w1, b1, w2, b2, w3, b3, w4, b4


@functools.partial(jax.jit, static_argnames=("tile_b",))
def simple_nn_forward(x, params, tile_b=DEFAULT_TILE_B):
    """params: dict with w1..w4 (in, out) and b1..b4 (1, out) in logical shapes."""
    B = x.shape[0]
    in_dim, out_dim = DIMS[0][0], DIMS[-1][1]

    # Tile size: multiple of 8, clamped so tiny batches use a single small tile.
    tile_b = min(tile_b, _round_up(B, 8))
    b_pad = _round_up(B, tile_b)
    num_tiles = pl.cdiv(b_pad, tile_b)

    # Pad + cast the activation stream (bf16) and parameters.
    x_p = jnp.pad(x, ((0, b_pad - B), (0, K_PAD - in_dim))).astype(jnp.bfloat16)
    w1, b1, w2, b2, w3, b3, w4, b4 = _pad_params(params)

    def const_spec(shape):
        # Full-array block, constant block index -> stays VMEM-resident.
        return pl.BlockSpec(shape, lambda i: tuple(0 for _ in shape))

    flops = 2 * B * sum(fi * fo for fi, fo in DIMS)
    bytes_accessed = (
        x_p.size * 2
        + sum(w.size * 2 for w in (w1, w2, w3, w4))
        + sum(b.size * 4 for b in (b1, b2, b3, b4))
        + b_pad * OUT_PAD * 4
    )

    out_padded = pl.pallas_call(
        mlp_kernel,
        out_shape=jax.ShapeDtypeStruct((b_pad, OUT_PAD), jnp.float32),
        grid=(num_tiles,),
        in_specs=[
            pl.BlockSpec((tile_b, K_PAD), lambda i: (i, 0)),   # x streams per tile
            const_spec(w1.shape), const_spec(b1.shape),
            const_spec(w2.shape), const_spec(b2.shape),
            const_spec(w3.shape), const_spec(b3.shape),
            const_spec(w4.shape), const_spec(b4.shape),
        ],
        out_specs=pl.BlockSpec((tile_b, OUT_PAD), lambda i: (i, 0)),
        compiler_params=pltpu.CompilerParams(
            dimension_semantics=("parallel",),
        ),
        cost_estimate=pl.CostEstimate(
            flops=flops, transcendentals=0, bytes_accessed=bytes_accessed),
    )(x_p, w1, b1, w2, b2, w3, b3, w4, b4)

    return out_padded[:B, :out_dim]


def init_params(key):
    """Deterministic init mimicking PyTorch nn.Linear default:
    U(-1/sqrt(fan_in), 1/sqrt(fan_in)) for both weight and bias."""
    params = {}
    keys = jax.random.split(key, 2 * len(DIMS))
    for i, (fan_in, fan_out) in enumerate(DIMS):
        bound = 1.0 / jnp.sqrt(float(fan_in))
        params[f"w{i + 1}"] = jax.random.uniform(
            keys[2 * i], (fan_in, fan_out), minval=-bound, maxval=bound,
            dtype=jnp.float32)
        params[f"b{i + 1}"] = jax.random.uniform(
            keys[2 * i + 1], (1, fan_out), minval=-bound, maxval=bound,
            dtype=jnp.float32)
    return params


def reference_forward(x, params):
    """Reference matching the kernel's numerics: bf16 operands, f32 accumulate."""
    h = x.astype(jnp.bfloat16).astype(jnp.float32)
    for i in range(1, 5):
        w = params[f"w{i}"].astype(jnp.bfloat16).astype(jnp.float32)
        h = h @ w + params[f"b{i}"]
        if i < 4:
            h = jnp.maximum(h, 0.0).astype(jnp.bfloat16).astype(jnp.float32)
    return h


if __name__ == "__main__":
    key = jax.random.PRNGKey(0)
    pkey, xkey1, xkey2 = jax.random.split(key, 3)
    params = init_params(pkey)

    # Small-batch check (single tile).
    batch = 8
    x = jax.random.normal(xkey1, (batch, 7), dtype=jnp.float32)
    out = simple_nn_forward(x, params)
    jax.block_until_ready(out)
    ref = reference_forward(x, params)
    assert out.shape == (batch, 2)
    assert jnp.allclose(out, ref, atol=1e-3, rtol=1e-3), "mismatch vs reference (small batch)"

    # Multi-tile check (exercises grid pipelining + batch padding).
    batch2 = 2050
    x2 = jax.random.normal(xkey2, (batch2, 7), dtype=jnp.float32)
    out2 = simple_nn_forward(x2, params)
    jax.block_until_ready(out2)
    ref2 = reference_forward(x2, params)
    assert out2.shape == (batch2, 2)
    assert jnp.allclose(out2, ref2, atol=1e-3, rtol=1e-3), "mismatch vs reference (multi tile)"

    print("KERNEL_OK")
</pallas_src>

<mosaic_0001>
module attributes {stable_mosaic.version = 11 : i64} {
  func.func @mlp_kernel(%arg0: i32, %arg1: memref<8x8xbf16, #tpu.memory_space<vmem>>, %arg2: memref<8x128xbf16, #tpu.memory_space<vmem>>, %arg3: memref<1x128xf32, #tpu.memory_space<vmem>>, %arg4: memref<128x128xbf16, #tpu.memory_space<vmem>>, %arg5: memref<1x128xf32, #tpu.memory_space<vmem>>, %arg6: memref<128x128xbf16, #tpu.memory_space<vmem>>, %arg7: memref<1x128xf32, #tpu.memory_space<vmem>>, %arg8: memref<128x128xbf16, #tpu.memory_space<vmem>>, %arg9: memref<1x128xf32, #tpu.memory_space<vmem>>, %arg10: memref<8x128xf32, #tpu.memory_space<vmem>>) attributes {dimension_semantics = [#tpu.dimension_semantics<parallel>], iteration_bounds = array<i64: 1>, scalar_prefetch = 0 : i64, scratch_operands = 0 : i64, tpu.core_type = #tpu.core_type<tc>, window_params = [{transform_indices = @transform_0, window_bounds = array<i64: 8, 8>}, {pipeline_mode = #tpu.pipeline_mode<synchronous>, transform_indices = @transform_1, window_bounds = array<i64: 8, 128>}, {pipeline_mode = #tpu.pipeline_mode<synchronous>, transform_indices = @transform_2, window_bounds = array<i64: 1, 128>}, {pipeline_mode = #tpu.pipeline_mode<synchronous>, transform_indices = @transform_3, window_bounds = array<i64: 128, 128>}, {pipeline_mode = #tpu.pipeline_mode<synchronous>, transform_indices = @transform_4, window_bounds = array<i64: 1, 128>}, {pipeline_mode = #tpu.pipeline_mode<synchronous>, transform_indices = @transform_5, window_bounds = array<i64: 128, 128>}, {pipeline_mode = #tpu.pipeline_mode<synchronous>, transform_indices = @transform_6, window_bounds = array<i64: 1, 128>}, {pipeline_mode = #tpu.pipeline_mode<synchronous>, transform_indices = @transform_7, window_bounds = array<i64: 128, 128>}, {pipeline_mode = #tpu.pipeline_mode<synchronous>, transform_indices = @transform_8, window_bounds = array<i64: 1, 128>}, {transform_indices = @transform_9, window_bounds = array<i64: 8, 128>}]} {
    %c0 = arith.constant 0 : index
    %c0_0 = arith.constant 0 : index
    %0 = vector.load %arg1[%c0, %c0_0] : memref<8x8xbf16, #tpu.memory_space<vmem>>, vector<8x8xbf16>
    %c0_1 = arith.constant 0 : index
    %c0_2 = arith.constant 0 : index
    %1 = vector.load %arg2[%c0_1, %c0_2] : memref<8x128xbf16, #tpu.memory_space<vmem>>, vector<8x128xbf16>
    %cst = arith.constant dense<0.000000e+00> : vector<8x128xf32>
    %2 = tpu.matmul %0, %1, %cst {dimension_numbers = #tpu.dot_dimension_numbers<[1], [0], [0], [1], [0, 0, 1, 1], [], []>} : vector<8x8xbf16>, vector<8x128xbf16>, vector<8x128xf32> -> vector<8x128xf32>
    %c0_3 = arith.constant 0 : index
    %c0_4 = arith.constant 0 : index
    %3 = vector.load %arg3[%c0_3, %c0_4] : memref<1x128xf32, #tpu.memory_space<vmem>>, vector<1x128xf32>
    %4 = vector.broadcast %3 : vector<1x128xf32> to vector<8x128xf32>
    %5 = arith.addf %2, %4 : vector<8x128xf32>
    %cst_5 = arith.constant 0.000000e+00 : f32
    %6 = vector.broadcast %cst_5 : f32 to vector<8x128xf32>
    %7 = arith.maximumf %5, %6 : vector<8x128xf32>
    %8 = arith.truncf %7 : vector<8x128xf32> to vector<8x128xbf16>
    %c0_6 = arith.constant 0 : index
    %c0_7 = arith.constant 0 : index
    %9 = vector.load %arg4[%c0_6, %c0_7] : memref<128x128xbf16, #tpu.memory_space<vmem>>, vector<128x128xbf16>
    %cst_8 = arith.constant dense<0.000000e+00> : vector<8x128xf32>
    %10 = tpu.matmul %8, %9, %cst_8 {dimension_numbers = #tpu.dot_dimension_numbers<[1], [0], [0], [1], [0, 0, 1, 1], [], []>} : vector<8x128xbf16>, vector<128x128xbf16>, vector<8x128xf32> -> vector<8x128xf32>
    %c0_9 = arith.constant 0 : index
    %c0_10 = arith.constant 0 : index
    %11 = vector.load %arg5[%c0_9, %c0_10] : memref<1x128xf32, #tpu.memory_space<vmem>>, vector<1x128xf32>
    %12 = vector.broadcast %11 : vector<1x128xf32> to vector<8x128xf32>
    %13 = arith.addf %10, %12 : vector<8x128xf32>
    %cst_11 = arith.constant 0.000000e+00 : f32
    %14 = vector.broadcast %cst_11 : f32 to vector<8x128xf32>
    %15 = arith.maximumf %13, %14 : vector<8x128xf32>
    %16 = arith.truncf %15 : vector<8x128xf32> to vector<8x128xbf16>
    %c0_12 = arith.constant 0 : index
    %c0_13 = arith.constant 0 : index
    %17 = vector.load %arg6[%c0_12, %c0_13] : memref<128x128xbf16, #tpu.memory_space<vmem>>, vector<128x128xbf16>
    %cst_14 = arith.constant dense<0.000000e+00> : vector<8x128xf32>
    %18 = tpu.matmul %16, %17, %cst_14 {dimension_numbers = #tpu.dot_dimension_numbers<[1], [0], [0], [1], [0, 0, 1, 1], [], []>} : vector<8x128xbf16>, vector<128x128xbf16>, vector<8x128xf32> -> vector<8x128xf32>
    %c0_15 = arith.constant 0 : index
    %c0_16 = arith.constant 0 : index
    %19 = vector.load %arg7[%c0_15, %c0_16] : memref<1x128xf32, #tpu.memory_space<vmem>>, vector<1x128xf32>
    %20 = vector.broadcast %19 : vector<1x128xf32> to vector<8x128xf32>
    %21 = arith.addf %18, %20 : vector<8x128xf32>
    %cst_17 = arith.constant 0.000000e+00 : f32
    %22 = vector.broadcast %cst_17 : f32 to vector<8x128xf32>
    %23 = arith.maximumf %21, %22 : vector<8x128xf32>
    %24 = arith.truncf %23 : vector<8x128xf32> to vector<8x128xbf16>
    %c0_18 = arith.constant 0 : index
    %c0_19 = arith.constant 0 : index
    %25 = vector.load %arg8[%c0_18, %c0_19] : memref<128x128xbf16, #tpu.memory_space<vmem>>, vector<128x128xbf16>
    %cst_20 = arith.constant dense<0.000000e+00> : vector<8x128xf32>
    %26 = tpu.matmul %24, %25, %cst_20 {dimension_numbers = #tpu.dot_dimension_numbers<[1], [0], [0], [1], [0, 0, 1, 1], [], []>} : vector<8x128xbf16>, vector<128x128xbf16>, vector<8x128xf32> -> vector<8x128xf32>
    %c0_21 = arith.constant 0 : index
    %c0_22 = arith.constant 0 : index
    %27 = vector.load %arg9[%c0_21, %c0_22] : memref<1x128xf32, #tpu.memory_space<vmem>>, vector<1x128xf32>
    %28 = vector.broadcast %27 : vector<1x128xf32> to vector<8x128xf32>
    %29 = arith.addf %26, %28 : vector<8x128xf32>
    %c0_23 = arith.constant 0 : index
    %c0_24 = arith.constant 0 : index
    %30 = vector.load %arg10[%c0_23, %c0_24] : memref<8x128xf32, #tpu.memory_space<vmem>>, vector<8x128xf32>
    tpu.vector_store %arg10[%c0_23, %c0_24], %29 {strides = array<i32>} : memref<8x128xf32, #tpu.memory_space<vmem>>, vector<8x128xf32>,
    return
  }
  func.func @transform_0(%arg0: i32) -> (i32, i32) {
    %c0_i32 = arith.constant 0 : i32
    %c0_i32_0 = arith.constant 0 : i32
    return %arg0, %c0_i32 : i32, i32
  }
  func.func @transform_1(%arg0: i32) -> (i32, i32) {
    %c0_i32 = arith.constant 0 : i32
    %c0_i32_0 = arith.constant 0 : i32
    %c0_i32_1 = arith.constant 0 : i32
    return %c0_i32, %c0_i32_0 : i32, i32
  }
  func.func @transform_2(%arg0: i32) -> (i32, i32) {
    %c0_i32 = arith.constant 0 : i32
    %c0_i32_0 = arith.constant 0 : i32
    %c0_i32_1 = arith.constant 0 : i32
    return %c0_i32, %c0_i32_0 : i32, i32
  }
  func.func @transform_3(%arg0: i32) -> (i32, i32) {
    %c0_i32 = arith.constant 0 : i32
    %c0_i32_0 = arith.constant 0 : i32
    %c0_i32_1 = arith.constant 0 : i32
    return %c0_i32, %c0_i32_0 : i32, i32
  }
  func.func @transform_4(%arg0: i32) -> (i32, i32) {
    %c0_i32 = arith.constant 0 : i32
    %c0_i32_0 = arith.constant 0 : i32
    %c0_i32_1 = arith.constant 0 : i32
    return %c0_i32, %c0_i32_0 : i32, i32
  }
  func.func @transform_5(%arg0: i32) -> (i32, i32) {
    %c0_i32 = arith.constant 0 : i32
    %c0_i32_0 = arith.constant 0 : i32
    %c0_i32_1 = arith.constant 0 : i32
    return %c0_i32, %c0_i32_0 : i32, i32
  }
  func.func @transform_6(%arg0: i32) -> (i32, i32) {
    %c0_i32 = arith.constant 0 : i32
    %c0_i32_0 = arith.constant 0 : i32
    %c0_i32_1 = arith.constant 0 : i32
    return %c0_i32, %c0_i32_0 : i32, i32
  }
  func.func @transform_7(%arg0: i32) -> (i32, i32) {
    %c0_i32 = arith.constant 0 : i32
    %c0_i32_0 = arith.constant 0 : i32
    %c0_i32_1 = arith.constant 0 : i32
    return %c0_i32, %c0_i32_0 : i32, i32
  }
  func.func @transform_8(%arg0: i32) -> (i32, i32) {
    %c0_i32 = arith.constant 0 : i32
    %c0_i32_0 = arith.constant 0 : i32
    %c0_i32_1 = arith.constant 0 : i32
    return %c0_i32, %c0_i32_0 : i32, i32
  }
  func.func @transform_9(%arg0: i32) -> (i32, i32) {
    %c0_i32 = arith.constant 0 : i32
    %c0_i32_0 = arith.constant 0 : i32
    return %arg0, %c0_i32 : i32, i32
  }
}

</mosaic_0001>

<bundles_post_ra>
// kernel: simple_nn_forward.1
= control target key start
LH: loop header
LB: loop body
LE: loop exit
PB: predicated region body
PF: predicated region fallthrough
CT: control target
= control target key end

     0   :  { %vm43_vm0 = vcmask 1043456   ;;  %vm39_vm1 = vcmask 64512   ;;  %s582_s1 = inlined_call_operand.vmem [shape: bf16[8,128], index: 1, kind: input, shape index: {}]   ;;  %s583_s0 = inlined_call_operand.vmem [shape: bf16[8,8], index: 0, kind: input, shape index: {}]   ;;  %s584_s3 = inlined_call_operand.vmem [shape: bf16[128,128], index: 3, kind: input, shape index: {}]   ;;  %s585_s2 = inlined_call_operand.vmem [shape: f32[1,128], index: 2, kind: input, shape index: {}]   ;;  %s586_s4 = inlined_call_operand.vmem [shape: f32[1,128], index: 4, kind: input, shape index: {}]   ;;  %s587_s5 = inlined_call_operand.vmem [shape: bf16[128,128], index: 5, kind: input, shape index: {}]   ;;  %s588_s6 = inlined_call_operand.vmem [shape: f32[1,128], index: 6, kind: input, shape index: {}]   ;;  %s589_s7 = inlined_call_operand.vmem [shape: bf16[128,128], index: 7, kind: input, shape index: {}]   ;;  %s590_s8 = inlined_call_operand.vmem [shape: f32[1,128], index: 8, kind: input, shape index: {}]   ;;  %s591_s9 = inlined_call_operand.vmem [shape: f32[8,128], index: 9, kind: output, shape index: {}]  }
   0x1   :  { %v34_v0 = vld [vmem:[%s582_s1] sm:$0xf]  ;;  %v418_v1 = vld [vmem:[%s584_s3 + $0x38] sm:$0xff]  ;;  %v417_v4 = vld [vmem:[%s584_s3 + $0x30] sm:$0xff] }
   0x2   :  { %v45_v2 = vsel %vm43_vm0, %v34_v0, 0  ;;  %v33_v3 = vld [vmem:[%s583_s0] sm:$0xf]  ;;  %130 = vmatpush.bf16.msra.mxu1 %v418_v1  ;;  %v416_v5 = vld [vmem:[%s584_s3 + $0x28] sm:$0xff]  ;;  %v414_v7 = vld [vmem:[%s584_s3 + $0x18] sm:$0xff] }
   0x3   :  { %54 = vmatpush.bf16.msra.mxu0 %v45_v2  ;;  %v415_v6 = vld [vmem:[%s584_s3 + $0x20] sm:$0xff]  ;;  %v413_v8 = vld [vmem:[%s584_s3 + $0x10] sm:$0xff]  ;;  %v412_v9 = vld [vmem:[%s584_s3 + $0x8] sm:$0xff] }
   0x4   :  { %v411_v10 = vld [vmem:[%s584_s3] sm:$0xff]  ;;  %v426_v11 = vld [vmem:[%s587_s5 + $0x38] sm:$0xff]  ;;  %v425_v12 = vld [vmem:[%s587_s5 + $0x30] sm:$0xff] }
   0x5   :  { %213 = vmatpush.bf16.msra.mxu2 %v426_v11  ;;  %v424_v13 = vld [vmem:[%s587_s5 + $0x28] sm:$0xff]  ;;  %v423_v14 = vld [vmem:[%s587_s5 + $0x20] sm:$0xff]  ;;  %v422_v15 = vld [vmem:[%s587_s5 + $0x18] sm:$0xff] }
   0x6   :  { %314 = vmatmul.msk.bf16.vlgmr.msra.gmra.mxu0 %vm39_vm1, %v33_v3  ;;  %131 = vmatpush.bf16.msra.mxu1 %v417_v4  ;;  %v421_v16 = vld [vmem:[%s587_s5 + $0x10] sm:$0xff]  ;;  %v435_v17 = vld [vmem:[%s585_s2] ss:$0 sm:$0xff]  ;;  %v420_v23 = vld [vmem:[%s587_s5 + $0x8] sm:$0xff] }
   0x7   :  { %v419_v24 = vld [vmem:[%s587_s5] sm:$0xff]  ;;  %v434_v25 = vld [vmem:[%s589_s7 + $0x38] sm:$0xff]  ;;  %v433_v26 = vld [vmem:[%s589_s7 + $0x30] sm:$0xff] }
   0x8   :  { %296 = vmatpush.bf16.msra.mxu3 %v434_v25  ;;  %v432_v27 = vld [vmem:[%s589_s7 + $0x28] sm:$0xff]  ;;  %v431_v28 = vld [vmem:[%s589_s7 + $0x20] sm:$0xff]  ;;  %v430_v29 = vld [vmem:[%s589_s7 + $0x18] sm:$0xff] }
   0x9   :  { %214 = vmatpush.bf16.msra.mxu2 %v425_v12  ;;  %v429_v30 = vld [vmem:[%s589_s7 + $0x10] sm:$0xff]  ;;  %v436_v31 = vld [vmem:[%s586_s4] ss:$0 sm:$0xff]  ;;  %v428_v37 = vld [vmem:[%s589_s7 + $0x8] sm:$0xff] }
   0xa   :  { %132 = vmatpush.bf16.msra.mxu1 %v416_v5  ;;  %v427_v38 = vld [vmem:[%s589_s7] sm:$0xff] }
   0xb   :  { %v437_v39 = vld [vmem:[%s588_s6] ss:$0 sm:$0xff] }
   0xc   :  { %297 = vmatpush.bf16.msra.mxu3 %v433_v26  ;;  %v438_v45 = vld [vmem:[%s590_s8] ss:$0 sm:$0xff] }
   0xd   :  { %215 = vmatpush.bf16.msra.mxu2 %v424_v13 }
   0xe   :  { %133 = vmatpush.bf16.msra.mxu1 %v415_v6 }
  0x10   :  { %298 = vmatpush.bf16.msra.mxu3 %v432_v27 }
  0x11   :  { %216 = vmatpush.bf16.msra.mxu2 %v423_v14 }
  0x12   :  { %134 = vmatpush.bf16.msra.mxu1 %v414_v7 }
  0x14   :  { %299 = vmatpush.bf16.msra.mxu3 %v431_v28 }
  0x15   :  { %217 = vmatpush.bf16.msra.mxu2 %v422_v15 }
  0x16   :  { %135 = vmatpush.bf16.msra.mxu1 %v413_v8 }
  0x18   :  { %300 = vmatpush.bf16.msra.mxu3 %v430_v29 }
  0x19   :  { %218 = vmatpush.bf16.msra.mxu2 %v421_v16 }
  0x1a   :  { %136 = vmatpush.bf16.msra.mxu1 %v412_v9 }
  0x1c   :  { %301 = vmatpush.bf16.msra.mxu3 %v429_v30 }
  0x1d   :  { %219 = vmatpush.bf16.msra.mxu2 %v420_v23 }
  0x1e   :  { %137 = vmatpush.bf16.msra.mxu1 %v411_v10 }
  0x20   :  { %302 = vmatpush.bf16.msra.mxu3 %v428_v37 }
  0x21   :  { %220 = vmatpush.bf16.msra.mxu2 %v419_v24 }
  0x24   :  { %303 = vmatpush.bf16.msra.mxu3 %v427_v38 }
  0x83   :  { %v56_v18 = vpop.f32.mrf.mxu0 }
  0x84   :  { %v57_v19 = vadd.f32 %v435_v17, %v56_v18 }
  0x86   :  { %v60_v20 = vmax.f32 %v57_v19, 0.0 }
  0x88   :  { %v61_v21 = vpack.c.bf16 %v60_v20, %v60_v20 }
  0x8a   :  { %138 = vmatmul.bf16.vlgmr.msra.gmra.mxu1 %v61_v21 }
  0x8b   :  { %v58_v22 = vpop.f32.mrf.mxu0 }
 0x107   :  { %v139_v32 = vpop.f32.mrf.mxu1 }
 0x108   :  { %v140_v33 = vadd.f32 %v436_v31, %v139_v32 }
 0x10a   :  { %v143_v34 = vmax.f32 %v140_v33, 0.0 }
 0x10c   :  { %v144_v35 = vpack.c.bf16 %v143_v34, %v143_v34 }
 0x10e   :  { %221 = vmatmul.bf16.vlgmr.msra.gmra.mxu2 %v144_v35 }
 0x10f   :  { %v141_v36 = vpop.f32.mrf.mxu1 }
 0x191   :  { %v222_v40 = vpop.f32.mrf.mxu2 }
 0x192   :  { %v223_v41 = vadd.f32 %v437_v39, %v222_v40 }
 0x194   :  { %v226_v42 = vmax.f32 %v223_v41, 0.0 }
 0x196   :  { %v227_v43 = vpack.c.bf16 %v226_v42, %v226_v42 }
 0x198   :  { %304 = vmatmul.bf16.vlgmr.msra.gmra.mxu3 %v227_v43 }
 0x199   :  { %v224_v44 = vpop.f32.mrf.mxu2 }
 0x21b   :  { %v305_v46 = vpop.f32.mrf.mxu3 }
 0x21c   :  { %v306_v47 = vadd.f32 %v438_v45, %v305_v46 }
 0x21e   :  { %309 = vst [vmem:[%s591_s9] sm:$0xff] %v306_v47 }
 0x223   :  { %v307_v48 = vpop.f32.mrf.mxu3 }

</bundles_post_ra>
